<compile_context>
chip_gen: v7x
topology: tpu7x:2x2x1
jax: 0.10.0
libtpu: 0.0.40
codegen_flags: <defaults>
</compile_context>

<pallas_src>
import jax
import jax.numpy as jnp
from jax.experimental import pallas as pl
from jax.experimental.pallas import tpu as pltpu


_EPS = 1e-5
_SLOPE = 0.2


def _round_up(x, m):
    return ((x + m - 1) // m) * m


def _round_down(x, m):
    return (x // m) * m


def _vmem_capacity_bytes():
    """Physical VMEM per TensorCore; conservative 64 MiB (v7x) fallback."""
    try:
        info = pltpu.get_tpu_info()
        cap = getattr(info, "vmem_capacity_bytes", None)
        if cap:
            return int(cap)
    except Exception:
        pass
    return 64 << 20


def _ln_leaky_epilogue(y, bias, gamma, beta):
    """Bias + LayerNorm (biased variance, eps=1e-5) + LeakyReLU(0.2), all in f32."""
    y = y + bias
    n_inv = jnp.float32(1.0 / y.shape[-1])
    # E[y^2] - E[y]^2: the two lane reductions are independent of each other.
    s1 = jnp.sum(y, axis=-1, keepdims=True)
    s2 = jnp.sum(y * y, axis=-1, keepdims=True)
    mean = s1 * n_inv
    var = s2 * n_inv - mean * mean
    inv = jax.lax.rsqrt(var + _EPS)
    y_norm = (y - mean) * inv * gamma + beta
    return jnp.where(y_norm >= 0, y_norm, _SLOPE * y_norm)


def _kernel_single_k(x_ref, w_ref, b_ref, g_ref, be_ref, o_ref):
    # Whole contraction in one block: no accumulator scratch, no RMW on the vst slot.
    y = jnp.dot(x_ref[...], w_ref[...], preferred_element_type=jnp.float32)
    o_ref[...] = _ln_leaky_epilogue(
        y, b_ref[...], g_ref[...], be_ref[...]).astype(o_ref.dtype)


def _kernel_multi_k(x_ref, w_ref, b_ref, g_ref, be_ref, o_ref, acc_ref):
    k = pl.program_id(1)
    part = jnp.dot(x_ref[...], w_ref[...], preferred_element_type=jnp.float32)

    @pl.when(k == 0)
    def _():
        acc_ref[...] = part                 # first K step: plain store, no zero-init + add

    @pl.when(k > 0)
    def _():
        acc_ref[...] = acc_ref[...] + part

    @pl.when(k == pl.num_programs(1) - 1)
    def _():
        o_ref[...] = _ln_leaky_epilogue(
            acc_ref[...], b_ref[...], g_ref[...], be_ref[...]).astype(o_ref.dtype)


def _select_tiles(B, insize, outsize, x_bytes, w_bytes, budget):
    """Pick (tb, tk, insize_padded, nk, vmem_need) fitting `budget` VMEM bytes."""
    # Sublane packing for the matmul input dtype: 8 (f32), 16 (bf16), 32 (int8).
    align = max(8, 32 // max(x_bytes, 1))
    param_bytes = 3 * 2 * outsize * 4               # bias/gamma/beta, double-buffered

    def need(tb, tk, nk):
        return (2 * tb * tk * x_bytes               # x double buffer
                + 2 * tk * outsize * w_bytes        # weight double buffer
                + 2 * tb * outsize * 4              # output double buffer (f32)
                + (tb * outsize * 4 if nk > 1 else 0)   # f32 accumulator scratch
                + param_bytes)

    # Preferred batch-tile ceiling scales with available VMEM
    # (bigger tiles on 128 MiB parts, smaller under v7x's 64 MiB).
    if budget >= (80 << 20):
        tb_cap = 1024
    elif budget >= (40 << 20):
        tb_cap = 512
    else:
        tb_cap = 256

    B_pad = _round_up(B, align)

    def best_tb(tk, nk):
        # Keep >= 2 batch tiles when the batch allows it, so the "parallel"
        # axis can shard across v7x's two TensorCores.
        if B_pad >= 2 * align:
            upper = max(align, min(tb_cap, _round_down(max(B_pad // 2, align), align)))
        else:
            upper = min(tb_cap, B_pad)
        upper = max(upper, align)
        cands = list(range(upper, align - 1, -align))
        for t in cands:                  # prefer tiles that divide B (no masked remainder)
            if B_pad % t == 0 and need(t, tk, nk) <= budget:
                return t
        for t in cands:
            if need(t, tk, nk) <= budget:
                return t
        return None

    # 1) Whole contraction as one block (nk == 1): weight resident, fetched once.
    tb = best_tb(insize, 1)
    if tb is not None:
        return tb, insize, insize, 1, need(tb, insize, 1)

    # 2) Tile the contraction: pad insize to a 128 multiple and take the largest
    #    128-multiple divisor whose weight slab still fits next to a batch tile.
    insize_p = _round_up(insize, 128)
    tk_cands = sorted(
        {d for d in range(128, insize_p + 1, 128) if insize_p % d == 0}, reverse=True)
    for tk in tk_cands:
        nk = insize_p // tk
        tb = best_tb(tk, nk)
        if tb is not None:
            return tb, tk, insize_p, nk, need(tb, tk, nk)

    # 3) Last resort: smallest sane tiles; the VMEM limit is raised to cover them.
    tk = 128
    nk = insize_p // tk
    return align, tk, insize_p, nk, need(align, tk, nk)


def basic_linear(x, weight, bias, gamma, beta, *, matmul_dtype=None):
    """Fused Linear -> LayerNorm -> LeakyReLU(0.2).

    x: (B, insize); weight: (outsize, insize) (nn.Linear layout);
    bias/gamma/beta: (outsize,). Returns (B, outsize) float32.
    matmul_dtype: optionally cast x / weight for the MXU (e.g. jnp.bfloat16 on
    v6e/v7x); accumulation and the LN/LeakyReLU epilogue stay in f32.
    """
    B, insize = x.shape
    outsize = weight.shape[0]

    # MXU-friendly layout: pre-transpose the weight ONCE outside the kernel so the
    # in-kernel contraction is a plain ((1,),(0,)) dot (no in-kernel transpose).
    w_t = weight.T
    if matmul_dtype is not None:
        x = x.astype(matmul_dtype)
        w_t = w_t.astype(matmul_dtype)

    x_bytes = jnp.dtype(x.dtype).itemsize
    w_bytes = jnp.dtype(w_t.dtype).itemsize

    cap = _vmem_capacity_bytes()
    budget = (cap * 3) // 4                      # leave ~25% headroom for Mosaic scratch
    tb, tk, insize_p, nk, vmem_need = _select_tiles(
        B, insize, outsize, x_bytes, w_bytes, budget)

    # Zero-pad the contraction axis if it had to be tiled to a 128 multiple
    # (zeros do not change the contraction).
    if insize_p != insize:
        x = jnp.pad(x, ((0, 0), (0, insize_p - insize)))
        w_t = jnp.pad(w_t, ((0, insize_p - insize), (0, 0)))

    nb = pl.cdiv(B, tb)

    b2 = bias.reshape(1, outsize).astype(jnp.float32)
    g2 = gamma.reshape(1, outsize).astype(jnp.float32)
    be2 = beta.reshape(1, outsize).astype(jnp.float32)

    if nk == 1:
        compiler_kwargs = dict(dimension_semantics=("parallel",))
    else:
        compiler_kwargs = dict(dimension_semantics=("parallel", "arbitrary"))
    # Raise the scoped-VMEM limit above v5e's 16 MiB default when needed, but
    # never above ~90% of this generation's physical VMEM.
    if vmem_need > (16 << 20):
        compiler_kwargs["vmem_limit_bytes"] = int(min(vmem_need * 5 // 4, cap * 9 // 10))

    w_fetches = 1 if nk == 1 else int(nb)        # weight re-fetched per batch tile when K is tiled
    cost = pl.CostEstimate(
        flops=2 * B * insize * outsize,
        transcendentals=B,                       # one rsqrt per row
        bytes_accessed=(B * insize_p * x_bytes
                        + insize_p * outsize * w_bytes * w_fetches
                        + 3 * outsize * 4
                        + B * outsize * 4))

    out_shape = jax.ShapeDtypeStruct((B, outsize), jnp.float32)

    # TODO(synk): single-buffer (pl.Buffered(1)) the resident weight / bias / gamma /
    # beta blocks once buffer_count=1 is reliably supported; the VMEM budget above
    # conservatively assumes double-buffering for all of them.
    if nk == 1:
        return pl.pallas_call(
            _kernel_single_k,
            out_shape=out_shape,
            grid=(nb,),
            in_specs=[
                pl.BlockSpec((tb, insize_p), lambda i: (i, 0)),       # x tile
                pl.BlockSpec((insize_p, outsize), lambda i: (0, 0)),  # weight (resident)
                pl.BlockSpec((1, outsize), lambda i: (0, 0)),         # bias
                pl.BlockSpec((1, outsize), lambda i: (0, 0)),         # gamma
                pl.BlockSpec((1, outsize), lambda i: (0, 0)),         # beta
            ],
            out_specs=pl.BlockSpec((tb, outsize), lambda i: (i, 0)),
            compiler_params=pltpu.CompilerParams(**compiler_kwargs),
            cost_estimate=cost,
        )(x, w_t, b2, g2, be2)

    return pl.pallas_call(
        _kernel_multi_k,
        out_shape=out_shape,
        grid=(nb, nk),
        in_specs=[
            pl.BlockSpec((tb, tk), lambda i, k: (i, k)),              # x tile
            pl.BlockSpec((tk, outsize), lambda i, k: (k, 0)),         # weight slab
            pl.BlockSpec((1, outsize), lambda i, k: (0, 0)),          # bias (resident)
            pl.BlockSpec((1, outsize), lambda i, k: (0, 0)),          # gamma (resident)
            pl.BlockSpec((1, outsize), lambda i, k: (0, 0)),          # beta (resident)
        ],
        out_specs=pl.BlockSpec((tb, outsize), lambda i, k: (i, 0)),
        scratch_shapes=[pltpu.VMEM((tb, outsize), jnp.float32)],
        compiler_params=pltpu.CompilerParams(**compiler_kwargs),
        cost_estimate=cost,
    )(x, w_t, b2, g2, be2)


if __name__ == "__main__":
    key = jax.random.PRNGKey(0)
    k_x, k_w, k_b, k_g, k_be = jax.random.split(key, 5)

    B, insize, outsize = 8, 32, 64

    x = jax.random.normal(k_x, (B, insize), dtype=jnp.float32)
    # Deterministic synthetic parameters (same shapes as nn.Linear / nn.LayerNorm)
    weight = jax.random.normal(k_w, (outsize, insize), dtype=jnp.float32) * 0.1
    bias = jax.random.normal(k_b, (outsize,), dtype=jnp.float32) * 0.1
    gamma = 1.0 + 0.1 * jax.random.normal(k_g, (outsize,), dtype=jnp.float32)
    beta = 0.1 * jax.random.normal(k_be, (outsize,), dtype=jnp.float32)

    out = basic_linear(x, weight, bias, gamma, beta)
    out = jax.block_until_ready(out)

    # Pure-JAX reference check
    y_ref = x @ weight.T + bias
    mu = y_ref.mean(-1, keepdims=True)
    var = ((y_ref - mu) ** 2).mean(-1, keepdims=True)
    y_ln = (y_ref - mu) / jnp.sqrt(var + 1e-5) * gamma + beta
    ref = jnp.where(y_ln >= 0, y_ln, 0.2 * y_ln)
    assert jnp.allclose(out, ref, atol=1e-4, rtol=1e-4), "mismatch vs reference"

    print("KERNEL_OK")
</pallas_src>

<mosaic_0001>
module attributes {stable_mosaic.version = 11 : i64} {
  func.func @_kernel_single_k(%arg0: i32, %arg1: memref<8x32xf32, #tpu.memory_space<vmem>>, %arg2: memref<32x64xf32, #tpu.memory_space<vmem>>, %arg3: memref<1x64xf32, #tpu.memory_space<vmem>>, %arg4: memref<1x64xf32, #tpu.memory_space<vmem>>, %arg5: memref<1x64xf32, #tpu.memory_space<vmem>>, %arg6: memref<8x64xf32, #tpu.memory_space<vmem>>) attributes {dimension_semantics = [#tpu.dimension_semantics<parallel>], iteration_bounds = array<i64: 1>, scalar_prefetch = 0 : i64, scratch_operands = 0 : i64, tpu.core_type = #tpu.core_type<tc>, window_params = [{transform_indices = @transform_0, window_bounds = array<i64: 8, 32>}, {pipeline_mode = #tpu.pipeline_mode<synchronous>, transform_indices = @transform_1, window_bounds = array<i64: 32, 64>}, {pipeline_mode = #tpu.pipeline_mode<synchronous>, transform_indices = @transform_2, window_bounds = array<i64: 1, 64>}, {pipeline_mode = #tpu.pipeline_mode<synchronous>, transform_indices = @transform_3, window_bounds = array<i64: 1, 64>}, {pipeline_mode = #tpu.pipeline_mode<synchronous>, transform_indices = @transform_4, window_bounds = array<i64: 1, 64>}, {transform_indices = @transform_5, window_bounds = array<i64: 8, 64>}]} {
    %c0 = arith.constant 0 : index
    %c0_0 = arith.constant 0 : index
    %0 = vector.load %arg1[%c0, %c0_0] : memref<8x32xf32, #tpu.memory_space<vmem>>, vector<8x32xf32>
    %c0_1 = arith.constant 0 : index
    %c0_2 = arith.constant 0 : index
    %1 = vector.load %arg2[%c0_1, %c0_2] : memref<32x64xf32, #tpu.memory_space<vmem>>, vector<32x64xf32>
    %cst = arith.constant dense<0.000000e+00> : vector<8x64xf32>
    %2 = tpu.matmul %0, %1, %cst {dimension_numbers = #tpu.dot_dimension_numbers<[1], [0], [0], [1], [0, 0, 1, 1], [], []>} : vector<8x32xf32>, vector<32x64xf32>, vector<8x64xf32> -> vector<8x64xf32>
    %c0_3 = arith.constant 0 : index
    %c0_4 = arith.constant 0 : index
    %3 = vector.load %arg3[%c0_3, %c0_4] : memref<1x64xf32, #tpu.memory_space<vmem>>, vector<1x64xf32>
    %c0_5 = arith.constant 0 : index
    %c0_6 = arith.constant 0 : index
    %4 = vector.load %arg4[%c0_5, %c0_6] : memref<1x64xf32, #tpu.memory_space<vmem>>, vector<1x64xf32>
    %c0_7 = arith.constant 0 : index
    %c0_8 = arith.constant 0 : index
    %5 = vector.load %arg5[%c0_7, %c0_8] : memref<1x64xf32, #tpu.memory_space<vmem>>, vector<1x64xf32>
    %6 = vector.broadcast %3 : vector<1x64xf32> to vector<8x64xf32>
    %7 = arith.addf %2, %6 : vector<8x64xf32>
    %cst_9 = arith.constant dense<0.000000e+00> : vector<8xf32>
    %8 = vector.multi_reduction <add>, %7, %cst_9 [1] : vector<8x64xf32> to vector<8xf32>
    %9 = vector.shape_cast %8 : vector<8xf32> to vector<8x1xf32>
    %10 = arith.mulf %7, %7 : vector<8x64xf32>
    %cst_10 = arith.constant dense<0.000000e+00> : vector<8xf32>
    %11 = vector.multi_reduction <add>, %10, %cst_10 [1] : vector<8x64xf32> to vector<8xf32>
    %12 = vector.shape_cast %11 : vector<8xf32> to vector<8x1xf32>
    %cst_11 = arith.constant 1.562500e-02 : f32
    %13 = vector.broadcast %cst_11 : f32 to vector<8x1xf32>
    %14 = arith.mulf %9, %13 : vector<8x1xf32>
    %cst_12 = arith.constant 1.562500e-02 : f32
    %15 = vector.broadcast %cst_12 : f32 to vector<8x1xf32>
    %16 = arith.mulf %12, %15 : vector<8x1xf32>
    %17 = arith.mulf %14, %14 : vector<8x1xf32>
    %18 = arith.subf %16, %17 : vector<8x1xf32>
    %cst_13 = arith.constant 9.99999974E-6 : f32
    %19 = vector.broadcast %cst_13 : f32 to vector<8x1xf32>
    %20 = arith.addf %18, %19 : vector<8x1xf32>
    %21 = math.rsqrt %20 : vector<8x1xf32>
    %22 = vector.broadcast %14 : vector<8x1xf32> to vector<8x64xf32>
    %23 = arith.subf %7, %22 : vector<8x64xf32>
    %24 = vector.broadcast %21 : vector<8x1xf32> to vector<8x64xf32>
    %25 = arith.mulf %23, %24 : vector<8x64xf32>
    %26 = vector.broadcast %4 : vector<1x64xf32> to vector<8x64xf32>
    %27 = arith.mulf %25, %26 : vector<8x64xf32>
    %28 = vector.broadcast %5 : vector<1x64xf32> to vector<8x64xf32>
    %29 = arith.addf %27, %28 : vector<8x64xf32>
    %cst_14 = arith.constant 0.000000e+00 : f32
    %30 = vector.broadcast %cst_14 : f32 to vector<8x64xf32>
    %31 = arith.cmpf oge, %29, %30 : vector<8x64xf32>
    %cst_15 = arith.constant 2.000000e-01 : f32
    %32 = vector.broadcast %cst_15 : f32 to vector<8x64xf32>
    %33 = arith.mulf %32, %29 : vector<8x64xf32>
    %34 = arith.select %31, %29, %33 : vector<8x64xi1>, vector<8x64xf32>
    %c0_16 = arith.constant 0 : index
    %c0_17 = arith.constant 0 : index
    %35 = vector.load %arg6[%c0_16, %c0_17] : memref<8x64xf32, #tpu.memory_space<vmem>>, vector<8x64xf32>
    tpu.vector_store %arg6[%c0_16, %c0_17], %34 {strides = array<i32>} : memref<8x64xf32, #tpu.memory_space<vmem>>, vector<8x64xf32>,
    return
  }
  func.func @transform_0(%arg0: i32) -> (i32, i32) {
    %c0_i32 = arith.constant 0 : i32
    %c0_i32_0 = arith.constant 0 : i32
    return %arg0, %c0_i32 : i32, i32
  }
  func.func @transform_1(%arg0: i32) -> (i32, i32) {
    %c0_i32 = arith.constant 0 : i32
    %c0_i32_0 = arith.constant 0 : i32
    %c0_i32_1 = arith.constant 0 : i32
    return %c0_i32, %c0_i32_0 : i32, i32
  }
  func.func @transform_2(%arg0: i32) -> (i32, i32) {
    %c0_i32 = arith.constant 0 : i32
    %c0_i32_0 = arith.constant 0 : i32
    %c0_i32_1 = arith.constant 0 : i32
    return %c0_i32, %c0_i32_0 : i32, i32
  }
  func.func @transform_3(%arg0: i32) -> (i32, i32) {
    %c0_i32 = arith.constant 0 : i32
    %c0_i32_0 = arith.constant 0 : i32
    %c0_i32_1 = arith.constant 0 : i32
    return %c0_i32, %c0_i32_0 : i32, i32
  }
  func.func @transform_4(%arg0: i32) -> (i32, i32) {
    %c0_i32 = arith.constant 0 : i32
    %c0_i32_0 = arith.constant 0 : i32
    %c0_i32_1 = arith.constant 0 : i32
    return %c0_i32, %c0_i32_0 : i32, i32
  }
  func.func @transform_5(%arg0: i32) -> (i32, i32) {
    %c0_i32 = arith.constant 0 : i32
    %c0_i32_0 = arith.constant 0 : i32
    return %arg0, %c0_i32 : i32, i32
  }
}

</mosaic_0001>

<bundles_post_ra>
// kernel: tpu_custom_call.1
= control target key start
LH: loop header
LB: loop body
LE: loop exit
PB: predicated region body
PF: predicated region fallthrough
CT: control target
= control target key end

     0   :  { %10 = vsyncpa [#allocation3], 0  ;;  %s386_s0 = inlined_call_operand.hbm [shape: f32[8,32], index: 0, kind: input, shape index: {}]   ;;  %s387_s1 = inlined_call_operand.hbm [shape: f32[32,64], index: 1, kind: input, shape index: {}]   ;;  %s388_s2 = inlined_call_operand.vmem [shape: f32[1,64], index: 2, kind: input, shape index: {}]   ;;  %s389_s3 = inlined_call_operand.vmem [shape: f32[1,64], index: 3, kind: input, shape index: {}]   ;;  %s390_s4 = inlined_call_operand.vmem [shape: f32[1,64], index: 4, kind: input, shape index: {}]   ;;  %s391_s5 = inlined_call_operand.hbm [shape: f32[8,64], index: 5, kind: output, shape index: {}]  }
   0x1   :  { %11 = vsyncpa [#allocation6], 0 }
   0x2   :  { %12 = vsyncpa [#allocation4], 0  ;;  %s293_s18 = smov [#allocation2]   ;;  %s294_s20 = smov [#allocation5]  }
   0x3   :  { %s19_s19 = sshll.u32 %s293_s18, 4  ;;  %s28_s21 = sshll.u32 %s294_s20, 4  ;;  %s20_s19 = int_to_ptr.vmem [resolvable:$true] %s19_s19  ;;  %s331_s21 = int_to_ptr.vmem [resolvable:$true] %s28_s21 }
   0x4   :  { %s221_s24 = scalar_lea.hbm %s386_s0, 128 }
   0x5   :  { %p222_p0 = scmp.ne.s32.totalorder %s386_s0, %s221_s24  ;;  %p225_p1 = scmp.lt.u32.totalorder %s221_s24, %s386_s0 }
   0x7   :  { %p227_p2 = pnand %p225_p1, %p222_p0 }
   0x9   :  { %230 = shalt.err (!%p227_p2)
}
   0xa   :  { %s231_s29 = scalar_lea.vmem %s20_s19, 128  ;;  %p236_p4 = scmp.lt.s32.totalorder %s20_s19, %s20_s19 }
   0xb   :  { %p232_p3 = scmp.ne.s32.totalorder %s20_s19, %s231_s29  ;;  %p237_p5 = scmp.lt.s32.totalorder %s231_s29, %s231_s29 }
   0xd   :  { %p238_p6 = por %p237_p5, %p236_p4 }
   0xf   :  { %p239_p7 = pnand %p238_p6, %p232_p3 }
  0x11   :  { %242 = shalt.err (!%p239_p7)
}
  0x12   :  { %22 = dma.hbm_to_vmem [thread:$0]  %s386_s0, 128, %s20_s19, [#allocation3]  }
  0x13   :  { %s243_s9 = scalar_lea.hbm %s387_s1, 512 }
  0x14   :  { %p244_p8 = scmp.ne.s32.totalorder %s387_s1, %s243_s9  ;;  %p247_p9 = scmp.lt.u32.totalorder %s243_s9, %s387_s1 }
  0x16   :  { %p249_p10 = pnand %p247_p9, %p244_p8 }
  0x18   :  { %252 = shalt.err (!%p249_p10)
}
  0x19   :  { %s253_s14 = scalar_lea.vmem %s331_s21, 512  ;;  %p258_p12 = scmp.lt.s32.totalorder %s331_s21, %s331_s21 }
  0x1a   :  { %p254_p11 = scmp.ne.s32.totalorder %s331_s21, %s253_s14  ;;  %p259_p13 = scmp.lt.s32.totalorder %s253_s14, %s253_s14 }
  0x1c   :  { %p260_p0 = por %p259_p13, %p258_p12 }
  0x1e   :  { %p261_p1 = pnand %p260_p0, %p254_p11 }
  0x20   :  { %264 = shalt.err (!%p261_p1)
}
  0x21   :  { %s295_s0 = smov 128   ;;  %s296_s15 = smov 8  }
  0x22   :  { %34 = dma.hbm_to_vmem [thread:$0]  %s387_s1, 512, %s331_s21, [#allocation6], %s295_s0, %s295_s0, %s296_s15  }
  0x23   :  { %287 = dma.done.wait [#allocation3], 128  }
  0x24   :  { %288 = vsyncadd [#allocation3], 4294967168 }
  0x25   :  { %289 = dma.done.wait [#allocation6], 512  }
  0x26   :  { %290 = vsyncadd [#allocation6], 4294966784  ;;  %v297_v0 = vmov 0.0|0.0   ;;  %vm298_vm0 = vmmov 0   ;;  %v299_v1 = vmov 0.0   ;;  %v48_v2 = vld [vmem:[#allocation5] sm:$0xff] }
  0x27   :  { %205 = vmatprep.subr.bf16.mxu0 %v297_v0  ;;  %202 = vmatprep.mubr.msk.f32.mxu0 %vm298_vm0, %v299_v1  ;;  %v49_v3 = vld [vmem:[#allocation5 + $0x8] sm:$0xff]  ;;  %v50_v4 = vld [vmem:[#allocation5 + $0x10] sm:$0xff]  ;;  %v51_v6 = vld [vmem:[#allocation5 + $0x18] sm:$0xff]  ;;  %vm61_vm1 = vcmask 261120   ;;  %vm135_vm2 = vcmask 523264   ;;  %s300_s22 = smov [#allocation7]  }
  0x28   :  { %v206_v5 = vpack.c.bf16 %v49_v3, %v48_v2  ;;  %v209_v7 = vpack.c.bf16 %v51_v6, %v50_v4  ;;  %v47_v8 = vld [vmem:[#allocation2] sm:$0xff]  ;;  %s175_s23 = sshll.u32 %s300_s22, 4  ;;  %s176_s23 = int_to_ptr.vmem [resolvable:$true] %s175_s23 }
  0x29   :  { %v185_v9 = vld [vmem:[%s388_s2] ss:$0 sm:$0xff]  ;;  %s265_s24 = scalar_lea.vmem %s176_s23, 128  ;;  %p270_p3 = scmp.lt.s32.totalorder %s176_s23, %s176_s23 }
  0x2a   :  { %207 = vmatpush3.bf16.msra.mxu0 %v206_v5  ;;  %v187_v25 = vld [vmem:[%s389_s3] ss:$0 sm:$0xff]  ;;  %p266_p2 = scmp.ne.s32.totalorder %s176_s23, %s265_s24  ;;  %p271_p4 = scmp.lt.s32.totalorder %s265_s24, %s265_s24 }
  0x2b   :  { %208 = vmatprep.subr.bf16.mxu0 %v297_v0  ;;  %v188_v27 = vld [vmem:[%s390_s4] ss:$0 sm:$0xff] }
  0x2c   :  { %p272_p5 = por %p271_p4, %p270_p3 }
  0x2e   :  { %210 = vmatpush3.bf16.msra.mxu0 %v209_v7  ;;  %p273_p6 = pnand %p272_p5, %p266_p2 }
  0x31   :  { %203 = vmatmul.mubr.msk.f32.vlgmr.msra.gmra.mrb[0].mxu0 %vm61_vm1, %v47_v8 }
 0x104   :  { %v131_v10 = vpop.f32.mrb[0].mxu0 }
 0x105   :  { %v132_v11 = vadd.f32 %v185_v9, %v131_v10  ;;  %v204_v12 = vpop.f32.mrb[1].mxu0 }
 0x107   :  { %v136_v13 = vsel %vm135_vm2, %v132_v11, 0.0  ;;  %v139_v14 = vmul.f32 %v132_v11, %v132_v11 }
 0x108   :  { %137 = vadd.xlane.f32.xlu0 %v136_v13 }
 0x109   :  { %v140_v15 = vsel %vm135_vm2, %v139_v14, 0.0 }
 0x10c   :  { %141 = vadd.xlane.f32.xlu0 %v140_v15 }
 0x195   :  { %v138_v16 = vpop.xlane.xlu0 %137 }
 0x196   :  { %v143_v17 = vmul.f32 0.015625, %v138_v16 }
 0x198   :  { %v145_v19 = vmul.f32 %v143_v17, %v143_v17  ;;  %v149_v23 = vsub.f32 %v132_v11, %v143_v17 }
 0x199   :  { %v142_v18 = vpop.xlane.xlu0 %141 }
 0x19a   :  { %v144_v20 = vmul.f32 0.015625, %v142_v18 }
 0x19c   :  { %v146_v21 = vsub.f32 %v144_v20, %v145_v19 }
 0x19e   :  { %v147_v22 = vadd.f32 1e-05, %v146_v21 }
 0x1a0   :  { %219 = vrsqrt.f32 %v147_v22 }
 0x1aa   :  { %v220_v24 = vpop.eup %219 }
 0x1ab   :  { %v150_v26 = vmul.f32 %v220_v24, %v149_v23 }
 0x1ad   :  { %v157_v28 = vmul.f32 %v187_v25, %v150_v26 }
 0x1af   :  { %v164_v29 = vadd.f32 %v188_v27, %v157_v28 }
 0x1b1   :  { %vm165_vm3 = vcmp.ge.f32.partialorder %v164_v29, 0.0  ;;  %v166_v30 = vmul.f32 0.2, %v164_v29 }
 0x1b3   :  { %v167_v31 = vsel %vm165_vm3, %v164_v29, %v166_v30 }
 0x1b4   :  { %168 = vst.msk [vmem:[#allocation7] sm:$0xff] %vm135_vm2, %v167_v31 }
 0x1b5   :  { %276 = shalt.err (!%p273_p6)
}
 0x1b6   :  { %s277_s4 = scalar_lea.hbm %s391_s5, 128 }
 0x1b7   :  { %p278_p7 = scmp.ne.s32.totalorder %s391_s5, %s277_s4  ;;  %p281_p8 = scmp.lt.u32.totalorder %s277_s4, %s391_s5 }
 0x1b9   :  { %p283_p9 = pnand %p281_p8, %p278_p7 }
 0x1bb   :  { %286 = shalt.err (!%p283_p9)
}
 0x1bc   :  { %178 = dma.vmem_to_hbm [thread:$0]  %s176_s23, 128, %s391_s5, [#allocation4]  }
 0x1bd   :  { %291 = dma.done.wait [#allocation4], 128  }
 0x1be   :  { %292 = vsyncadd [#allocation4], 4294967168 }
 0x1bf   :  { %182 = vsyncpa [#allocation3], 1 }
 0x1c0   :  { %183 = vsyncpa [#allocation6], 1 }
 0x1c1   :  { %184 = vsyncpa [#allocation4], 1 }

</bundles_post_ra>
